<compile_context>
chip_gen: v5e
topology: v5e:2x2
jax: 0.10.0
libtpu: 0.0.40
codegen_flags: <defaults>
</compile_context>

<pallas_src>
import jax
import jax.numpy as jnp
from jax import lax
from jax.experimental import pallas as pl
from jax.experimental.pallas import tpu as pltpu


# ---------------------------------------------------------------------------
# Model dimensions (small, consistent with the module's forward)
# ---------------------------------------------------------------------------
VOCAB = 64
EMB_DIM = 32
HIDDEN_DIM = 32      # hidden_dim of the pretrained LM's LSTM
MLP_DIM = 256        # nn.Linear(hidden_dim, 256)
OUTPUT_DIM = 1       # nn.Linear(256, output_dim); squeeze(1) => (batch,)
SEQ = 8
BATCH = 2
PBATCH = 8           # batch rows padded to a full sublane group
OUT_LANES = 128      # lane-dense output slab width


def sentiment_kernel(tok_ref, eproj_ref, whh_ref, b_ref,
                     w1_ref, b1_ref, w2_ref, b2_ref, out_ref):
    """Fused embedding+input projection, LSTM recurrence, classifier MLP.

    tok_ref   : (SEQ*PBATCH, VOCAB) int32  token id of row t*PBATCH+b broadcast
                                           across all VOCAB lanes
    eproj_ref : (VOCAB, 4H) bf16           embedding @ W_ih^T, gate-scaled
                                           (PyTorch gate order i, f, g, o)
    whh_ref   : (H, 4H) bf16               W_hh^T, gate-scaled
    b_ref     : (1, 4H) f32                (b_ih + b_hh), gate-scaled
    w1_ref    : (H, MLP) bf16              classifier Linear(H,256) weight^T
    b1_ref    : (1, MLP) f32
    w2_ref    : (1, MLP) f32               classifier Linear(256,1) weight row
    b2_ref    : (1, 1) f32
    out_ref   : (PBATCH, OUT_LANES) f32    logits broadcast across lanes
    """
    H = HIDDEN_DIM

    # ---- one-hot compare (pure VPU: tokens already lane-replicated) ----
    one_hot = (tok_ref[...] ==
               lax.broadcasted_iota(jnp.int32, (SEQ * PBATCH, VOCAB), 1)
               ).astype(jnp.bfloat16)                                # (64, 64)

    # ---- folded embedding lookup + input projection: single MXU push ----
    xw = jnp.dot(one_hot, eproj_ref[...],
                 preferred_element_type=jnp.float32) + b_ref[...]    # (64, 4H)

    # ---- LSTM recurrence, fully unrolled; h (bf16) / c (f32) live in vregs ----
    whh = whh_ref[...]                                               # hoisted
    h = jnp.zeros((PBATCH, H), jnp.bfloat16)
    c = jnp.zeros((PBATCH, H), jnp.float32)
    for t in range(SEQ):                                             # static
        # sublane-aligned whole-(8,128) slice of the hoisted projection
        gates = xw[t * PBATCH:(t + 1) * PBATCH, :] + jnp.dot(
            h, whh, preferred_element_type=jnp.float32)              # (8, 4H)
        # Single EUP pass over all gates: i/f/o columns were pre-scaled by 0.5,
        # so sigmoid(pre) = 0.5*(tanh(pre/2)+1) = 0.5*(th+1); g column is plain
        # tanh(pre) = th.
        th = jnp.tanh(gates)
        sig = 0.5 * th + 0.5
        i_g = sig[:, 0 * H:1 * H]
        f_g = sig[:, 1 * H:2 * H]
        g_g = th[:, 2 * H:3 * H]
        o_g = sig[:, 3 * H:4 * H]
        c = f_g * c + i_g * g_g
        h = (o_g * jnp.tanh(c)).astype(jnp.bfloat16)

    # sentence_embedding = hidden[-1, :, :]  (single-layer LSTM => final h)
    # ---- classifier: Linear -> ReLU -> Dropout(eval: identity) -> Linear ----
    # TODO(synk): nn.Dropout treated as identity (eval mode); training-mode
    # dropout would need pltpu.prng_seed + prng_random_bits masking.
    z1 = jnp.maximum(
        jnp.dot(h, w1_ref[...], preferred_element_type=jnp.float32)
        + b1_ref[...], 0.0)                                          # (8, MLP)
    # 256->1 head as VPU mul + lane reduction (avoids an N=1 MXU matmul).
    logits = (jnp.sum(z1 * w2_ref[...], axis=-1, keepdims=True)
              + b2_ref[...])                                         # (8, 1)
    # Lane-dense store: broadcast the single logit column across 128 lanes.
    out_ref[...] = jnp.broadcast_to(logits, (PBATCH, OUT_LANES))


def sentiment_forward(x_tokens, params):
    """Full forward pass. x_tokens: (SEQ, batch<=PBATCH) int32 token ids."""
    seq, batch = x_tokens.shape
    # Pad batch rows to a full sublane group, flatten (row = t*PBATCH + b),
    # and replicate each token id across the VOCAB lanes for the in-kernel
    # one-hot compare (no XLU broadcast, no 1-lane VMEM tile).
    tok = jnp.pad(x_tokens.astype(jnp.int32), ((0, 0), (0, PBATCH - batch)))
    tok = jnp.broadcast_to(tok.reshape(seq * PBATCH, 1), (seq * PBATCH, VOCAB))

    vmem_spec = pl.BlockSpec(memory_space=pltpu.MemorySpace.VMEM)

    out = pl.pallas_call(
        sentiment_kernel,
        out_shape=jax.ShapeDtypeStruct((PBATCH, OUT_LANES), jnp.float32),
        in_specs=[vmem_spec] * 8,
        out_specs=vmem_spec,
    )(
        tok,
        params["e_proj"], params["w_hh_t"], params["b_lstm"],
        params["w1_t"], params["b1"], params["w2_row"], params["b2"],
    )

    # prediction.squeeze(1): real batch rows, logit column 0
    return out[:batch, 0]


def prepare_params(raw):
    """Offline folding/scaling of PyTorch-layout weights for the kernel.

    raw (all f32, PyTorch layouts):
      embedding (VOCAB, EMB), w_ih (4H, EMB), w_hh (4H, H),
      b_ih (4H,), b_hh (4H,), w1 (MLP, H), b1 (MLP,), w2 (1, MLP), b2 (1,)
    Gate order along the 4H axis is PyTorch's: i, f, g, o.
    """
    H = HIDDEN_DIM
    # Fold embedding table into the input projection (LSTM is frozen).
    e_proj = raw["embedding"] @ raw["w_ih"].T            # (VOCAB, 4H)
    whh_t = raw["w_hh"].T                                # (H, 4H)
    b = (raw["b_ih"] + raw["b_hh"])[None, :]             # (1, 4H)  b_ih + b_hh!
    # Pre-scale the i/f/o gate columns (weights AND bias) by 0.5 so a single
    # tanh recovers all gates: sigmoid(x) = 0.5*(tanh(x/2)+1); g stays tanh.
    scale = (jnp.ones((4 * H,), jnp.float32)
             .at[0:2 * H].set(0.5)          # i, f
             .at[3 * H:4 * H].set(0.5))     # o
    e_proj = e_proj * scale
    whh_t = whh_t * scale
    b = b * scale
    return {
        "e_proj": e_proj.astype(jnp.bfloat16),           # (VOCAB, 4H)
        "w_hh_t": whh_t.astype(jnp.bfloat16),            # (H, 4H)
        "b_lstm": b,                                     # (1, 4H) f32
        "w1_t": raw["w1"].T.astype(jnp.bfloat16),        # (H, MLP)
        "b1": raw["b1"][None, :],                        # (1, MLP) f32
        "w2_row": raw["w2"],                             # (1, MLP) f32
        "b2": raw["b2"][None, :],                        # (1, 1) f32
    }


def init_params(key):
    """Random f32 params in PyTorch layouts (what a real checkpoint would give)."""
    ks = jax.random.split(key, 9)
    s = 0.1
    return {
        "embedding": s * jax.random.normal(ks[0], (VOCAB, EMB_DIM), jnp.float32),
        "w_ih": s * jax.random.normal(ks[1], (4 * HIDDEN_DIM, EMB_DIM), jnp.float32),
        "w_hh": s * jax.random.normal(ks[2], (4 * HIDDEN_DIM, HIDDEN_DIM), jnp.float32),
        "b_ih": s * jax.random.normal(ks[3], (4 * HIDDEN_DIM,), jnp.float32),
        "b_hh": s * jax.random.normal(ks[4], (4 * HIDDEN_DIM,), jnp.float32),
        "w1": s * jax.random.normal(ks[5], (MLP_DIM, HIDDEN_DIM), jnp.float32),
        "b1": s * jax.random.normal(ks[6], (MLP_DIM,), jnp.float32),
        "w2": s * jax.random.normal(ks[7], (OUTPUT_DIM, MLP_DIM), jnp.float32),
        "b2": s * jax.random.normal(ks[8], (OUTPUT_DIM,), jnp.float32),
    }


if __name__ == "__main__":
    key = jax.random.PRNGKey(0)
    pkey, xkey = jax.random.split(key)
    params = prepare_params(init_params(pkey))   # offline fold/scale/cast

    # x: (seq=8, batch=2) int32 token indices
    x = jax.random.randint(xkey, (SEQ, BATCH), 0, VOCAB, dtype=jnp.int32)

    out = jax.jit(sentiment_forward)(x, params)
    out = jax.block_until_ready(out)
    assert out.shape == (BATCH,), out.shape
    print("KERNEL_OK")
</pallas_src>

<mosaic_0001>
module attributes {stable_mosaic.version = 11 : i64} {
  func.func @sentiment_kernel(%arg0: memref<64x64xi32, #tpu.memory_space<vmem>>, %arg1: memref<64x128xbf16, #tpu.memory_space<vmem>>, %arg2: memref<32x128xbf16, #tpu.memory_space<vmem>>, %arg3: memref<1x128xf32, #tpu.memory_space<vmem>>, %arg4: memref<32x256xbf16, #tpu.memory_space<vmem>>, %arg5: memref<1x256xf32, #tpu.memory_space<vmem>>, %arg6: memref<1x256xf32, #tpu.memory_space<vmem>>, %arg7: memref<1x1xf32, #tpu.memory_space<vmem>>, %arg8: memref<8x128xf32, #tpu.memory_space<vmem>>) attributes {dimension_semantics = [], scalar_prefetch = 0 : i64, scratch_operands = 0 : i64, tpu.core_type = #tpu.core_type<tc>} {
    %c0 = arith.constant 0 : index
    %c0_0 = arith.constant 0 : index
    %0 = vector.load %arg0[%c0, %c0_0] : memref<64x64xi32, #tpu.memory_space<vmem>>, vector<64x64xi32>
    %1 = tpu.iota {dimensions = array<i32: 1>} : vector<64x64xi32>
    %2 = arith.cmpi eq, %0, %1 : vector<64x64xi32>
    %3 = arith.extui %2 : vector<64x64xi1> to vector<64x64xi32>
    %4 = arith.sitofp %3 : vector<64x64xi32> to vector<64x64xf32>
    %5 = arith.truncf %4 : vector<64x64xf32> to vector<64x64xbf16>
    %c0_1 = arith.constant 0 : index
    %c0_2 = arith.constant 0 : index
    %6 = vector.load %arg1[%c0_1, %c0_2] : memref<64x128xbf16, #tpu.memory_space<vmem>>, vector<64x128xbf16>
    %cst = arith.constant dense<0.000000e+00> : vector<64x128xf32>
    %7 = tpu.matmul %5, %6, %cst {dimension_numbers = #tpu.dot_dimension_numbers<[1], [0], [0], [1], [0, 0, 1, 1], [], []>} : vector<64x64xbf16>, vector<64x128xbf16>, vector<64x128xf32> -> vector<64x128xf32>
    %c0_3 = arith.constant 0 : index
    %c0_4 = arith.constant 0 : index
    %8 = vector.load %arg3[%c0_3, %c0_4] : memref<1x128xf32, #tpu.memory_space<vmem>>, vector<1x128xf32>
    %9 = vector.broadcast %8 : vector<1x128xf32> to vector<64x128xf32>
    %10 = arith.addf %7, %9 : vector<64x128xf32>
    %c0_5 = arith.constant 0 : index
    %c0_6 = arith.constant 0 : index
    %11 = vector.load %arg2[%c0_5, %c0_6] : memref<32x128xbf16, #tpu.memory_space<vmem>>, vector<32x128xbf16>
    %cst_7 = arith.constant 0.000000e+00 : bf16
    %12 = vector.broadcast %cst_7 : bf16 to vector<8x32xbf16>
    %cst_8 = arith.constant 0.000000e+00 : f32
    %13 = vector.broadcast %cst_8 : f32 to vector<8x32xf32>
    %14 = vector.extract_strided_slice %10 {offsets = [0, 0], sizes = [8, 128], strides = [1, 1]} : vector<64x128xf32> to vector<8x128xf32>
    %cst_9 = arith.constant dense<0.000000e+00> : vector<8x128xf32>
    %15 = tpu.matmul %12, %11, %cst_9 {dimension_numbers = #tpu.dot_dimension_numbers<[1], [0], [0], [1], [0, 0, 1, 1], [], []>} : vector<8x32xbf16>, vector<32x128xbf16>, vector<8x128xf32> -> vector<8x128xf32>
    %16 = arith.addf %14, %15 : vector<8x128xf32>
    %17 = math.tanh %16 : vector<8x128xf32>
    %cst_10 = arith.constant 5.000000e-01 : f32
    %18 = vector.broadcast %cst_10 : f32 to vector<8x128xf32>
    %19 = arith.mulf %18, %17 : vector<8x128xf32>
    %cst_11 = arith.constant 5.000000e-01 : f32
    %20 = vector.broadcast %cst_11 : f32 to vector<8x128xf32>
    %21 = arith.addf %19, %20 : vector<8x128xf32>
    %22 = vector.extract_strided_slice %21 {offsets = [0, 0], sizes = [8, 32], strides = [1, 1]} : vector<8x128xf32> to vector<8x32xf32>
    %23 = vector.extract_strided_slice %21 {offsets = [0, 32], sizes = [8, 32], strides = [1, 1]} : vector<8x128xf32> to vector<8x32xf32>
    %24 = vector.extract_strided_slice %17 {offsets = [0, 64], sizes = [8, 32], strides = [1, 1]} : vector<8x128xf32> to vector<8x32xf32>
    %25 = vector.extract_strided_slice %21 {offsets = [0, 96], sizes = [8, 32], strides = [1, 1]} : vector<8x128xf32> to vector<8x32xf32>
    %26 = arith.mulf %23, %13 : vector<8x32xf32>
    %27 = arith.mulf %22, %24 : vector<8x32xf32>
    %28 = arith.addf %26, %27 : vector<8x32xf32>
    %29 = math.tanh %28 : vector<8x32xf32>
    %30 = arith.mulf %25, %29 : vector<8x32xf32>
    %31 = arith.truncf %30 : vector<8x32xf32> to vector<8x32xbf16>
    %32 = vector.extract_strided_slice %10 {offsets = [8, 0], sizes = [8, 128], strides = [1, 1]} : vector<64x128xf32> to vector<8x128xf32>
    %cst_12 = arith.constant dense<0.000000e+00> : vector<8x128xf32>
    %33 = tpu.matmul %31, %11, %cst_12 {dimension_numbers = #tpu.dot_dimension_numbers<[1], [0], [0], [1], [0, 0, 1, 1], [], []>} : vector<8x32xbf16>, vector<32x128xbf16>, vector<8x128xf32> -> vector<8x128xf32>
    %34 = arith.addf %32, %33 : vector<8x128xf32>
    %35 = math.tanh %34 : vector<8x128xf32>
    %cst_13 = arith.constant 5.000000e-01 : f32
    %36 = vector.broadcast %cst_13 : f32 to vector<8x128xf32>
    %37 = arith.mulf %36, %35 : vector<8x128xf32>
    %cst_14 = arith.constant 5.000000e-01 : f32
    %38 = vector.broadcast %cst_14 : f32 to vector<8x128xf32>
    %39 = arith.addf %37, %38 : vector<8x128xf32>
    %40 = vector.extract_strided_slice %39 {offsets = [0, 0], sizes = [8, 32], strides = [1, 1]} : vector<8x128xf32> to vector<8x32xf32>
    %41 = vector.extract_strided_slice %39 {offsets = [0, 32], sizes = [8, 32], strides = [1, 1]} : vector<8x128xf32> to vector<8x32xf32>
    %42 = vector.extract_strided_slice %35 {offsets = [0, 64], sizes = [8, 32], strides = [1, 1]} : vector<8x128xf32> to vector<8x32xf32>
    %43 = vector.extract_strided_slice %39 {offsets = [0, 96], sizes = [8, 32], strides = [1, 1]} : vector<8x128xf32> to vector<8x32xf32>
    %44 = arith.mulf %41, %28 : vector<8x32xf32>
    %45 = arith.mulf %40, %42 : vector<8x32xf32>
    %46 = arith.addf %44, %45 : vector<8x32xf32>
    %47 = math.tanh %46 : vector<8x32xf32>
    %48 = arith.mulf %43, %47 : vector<8x32xf32>
    %49 = arith.truncf %48 : vector<8x32xf32> to vector<8x32xbf16>
    %50 = vector.extract_strided_slice %10 {offsets = [16, 0], sizes = [8, 128], strides = [1, 1]} : vector<64x128xf32> to vector<8x128xf32>
    %cst_15 = arith.constant dense<0.000000e+00> : vector<8x128xf32>
    %51 = tpu.matmul %49, %11, %cst_15 {dimension_numbers = #tpu.dot_dimension_numbers<[1], [0], [0], [1], [0, 0, 1, 1], [], []>} : vector<8x32xbf16>, vector<32x128xbf16>, vector<8x128xf32> -> vector<8x128xf32>
    %52 = arith.addf %50, %51 : vector<8x128xf32>
    %53 = math.tanh %52 : vector<8x128xf32>
    %cst_16 = arith.constant 5.000000e-01 : f32
    %54 = vector.broadcast %cst_16 : f32 to vector<8x128xf32>
    %55 = arith.mulf %54, %53 : vector<8x128xf32>
    %cst_17 = arith.constant 5.000000e-01 : f32
    %56 = vector.broadcast %cst_17 : f32 to vector<8x128xf32>
    %57 = arith.addf %55, %56 : vector<8x128xf32>
    %58 = vector.extract_strided_slice %57 {offsets = [0, 0], sizes = [8, 32], strides = [1, 1]} : vector<8x128xf32> to vector<8x32xf32>
    %59 = vector.extract_strided_slice %57 {offsets = [0, 32], sizes = [8, 32], strides = [1, 1]} : vector<8x128xf32> to vector<8x32xf32>
    %60 = vector.extract_strided_slice %53 {offsets = [0, 64], sizes = [8, 32], strides = [1, 1]} : vector<8x128xf32> to vector<8x32xf32>
    %61 = vector.extract_strided_slice %57 {offsets = [0, 96], sizes = [8, 32], strides = [1, 1]} : vector<8x128xf32> to vector<8x32xf32>
    %62 = arith.mulf %59, %46 : vector<8x32xf32>
    %63 = arith.mulf %58, %60 : vector<8x32xf32>
    %64 = arith.addf %62, %63 : vector<8x32xf32>
    %65 = math.tanh %64 : vector<8x32xf32>
    %66 = arith.mulf %61, %65 : vector<8x32xf32>
    %67 = arith.truncf %66 : vector<8x32xf32> to vector<8x32xbf16>
    %68 = vector.extract_strided_slice %10 {offsets = [24, 0], sizes = [8, 128], strides = [1, 1]} : vector<64x128xf32> to vector<8x128xf32>
    %cst_18 = arith.constant dense<0.000000e+00> : vector<8x128xf32>
    %69 = tpu.matmul %67, %11, %cst_18 {dimension_numbers = #tpu.dot_dimension_numbers<[1], [0], [0], [1], [0, 0, 1, 1], [], []>} : vector<8x32xbf16>, vector<32x128xbf16>, vector<8x128xf32> -> vector<8x128xf32>
    %70 = arith.addf %68, %69 : vector<8x128xf32>
    %71 = math.tanh %70 : vector<8x128xf32>
    %cst_19 = arith.constant 5.000000e-01 : f32
    %72 = vector.broadcast %cst_19 : f32 to vector<8x128xf32>
    %73 = arith.mulf %72, %71 : vector<8x128xf32>
    %cst_20 = arith.constant 5.000000e-01 : f32
    %74 = vector.broadcast %cst_20 : f32 to vector<8x128xf32>
    %75 = arith.addf %73, %74 : vector<8x128xf32>
    %76 = vector.extract_strided_slice %75 {offsets = [0, 0], sizes = [8, 32], strides = [1, 1]} : vector<8x128xf32> to vector<8x32xf32>
    %77 = vector.extract_strided_slice %75 {offsets = [0, 32], sizes = [8, 32], strides = [1, 1]} : vector<8x128xf32> to vector<8x32xf32>
    %78 = vector.extract_strided_slice %71 {offsets = [0, 64], sizes = [8, 32], strides = [1, 1]} : vector<8x128xf32> to vector<8x32xf32>
    %79 = vector.extract_strided_slice %75 {offsets = [0, 96], sizes = [8, 32], strides = [1, 1]} : vector<8x128xf32> to vector<8x32xf32>
    %80 = arith.mulf %77, %64 : vector<8x32xf32>
    %81 = arith.mulf %76, %78 : vector<8x32xf32>
    %82 = arith.addf %80, %81 : vector<8x32xf32>
    %83 = math.tanh %82 : vector<8x32xf32>
    %84 = arith.mulf %79, %83 : vector<8x32xf32>
    %85 = arith.truncf %84 : vector<8x32xf32> to vector<8x32xbf16>
    %86 = vector.extract_strided_slice %10 {offsets = [32, 0], sizes = [8, 128], strides = [1, 1]} : vector<64x128xf32> to vector<8x128xf32>
    %cst_21 = arith.constant dense<0.000000e+00> : vector<8x128xf32>
    %87 = tpu.matmul %85, %11, %cst_21 {dimension_numbers = #tpu.dot_dimension_numbers<[1], [0], [0], [1], [0, 0, 1, 1], [], []>} : vector<8x32xbf16>, vector<32x128xbf16>, vector<8x128xf32> -> vector<8x128xf32>
    %88 = arith.addf %86, %87 : vector<8x128xf32>
    %89 = math.tanh %88 : vector<8x128xf32>
    %cst_22 = arith.constant 5.000000e-01 : f32
    %90 = vector.broadcast %cst_22 : f32 to vector<8x128xf32>
    %91 = arith.mulf %90, %89 : vector<8x128xf32>
    %cst_23 = arith.constant 5.000000e-01 : f32
    %92 = vector.broadcast %cst_23 : f32 to vector<8x128xf32>
    %93 = arith.addf %91, %92 : vector<8x128xf32>
    %94 = vector.extract_strided_slice %93 {offsets = [0, 0], sizes = [8, 32], strides = [1, 1]} : vector<8x128xf32> to vector<8x32xf32>
    %95 = vector.extract_strided_slice %93 {offsets = [0, 32], sizes = [8, 32], strides = [1, 1]} : vector<8x128xf32> to vector<8x32xf32>
    %96 = vector.extract_strided_slice %89 {offsets = [0, 64], sizes = [8, 32], strides = [1, 1]} : vector<8x128xf32> to vector<8x32xf32>
    %97 = vector.extract_strided_slice %93 {offsets = [0, 96], sizes = [8, 32], strides = [1, 1]} : vector<8x128xf32> to vector<8x32xf32>
    %98 = arith.mulf %95, %82 : vector<8x32xf32>
    %99 = arith.mulf %94, %96 : vector<8x32xf32>
    %100 = arith.addf %98, %99 : vector<8x32xf32>
    %101 = math.tanh %100 : vector<8x32xf32>
    %102 = arith.mulf %97, %101 : vector<8x32xf32>
    %103 = arith.truncf %102 : vector<8x32xf32> to vector<8x32xbf16>
    %104 = vector.extract_strided_slice %10 {offsets = [40, 0], sizes = [8, 128], strides = [1, 1]} : vector<64x128xf32> to vector<8x128xf32>
    %cst_24 = arith.constant dense<0.000000e+00> : vector<8x128xf32>
    %105 = tpu.matmul %103, %11, %cst_24 {dimension_numbers = #tpu.dot_dimension_numbers<[1], [0], [0], [1], [0, 0, 1, 1], [], []>} : vector<8x32xbf16>, vector<32x128xbf16>, vector<8x128xf32> -> vector<8x128xf32>
    %106 = arith.addf %104, %105 : vector<8x128xf32>
    %107 = math.tanh %106 : vector<8x128xf32>
    %cst_25 = arith.constant 5.000000e-01 : f32
    %108 = vector.broadcast %cst_25 : f32 to vector<8x128xf32>
    %109 = arith.mulf %108, %107 : vector<8x128xf32>
    %cst_26 = arith.constant 5.000000e-01 : f32
    %110 = vector.broadcast %cst_26 : f32 to vector<8x128xf32>
    %111 = arith.addf %109, %110 : vector<8x128xf32>
    %112 = vector.extract_strided_slice %111 {offsets = [0, 0], sizes = [8, 32], strides = [1, 1]} : vector<8x128xf32> to vector<8x32xf32>
    %113 = vector.extract_strided_slice %111 {offsets = [0, 32], sizes = [8, 32], strides = [1, 1]} : vector<8x128xf32> to vector<8x32xf32>
    %114 = vector.extract_strided_slice %107 {offsets = [0, 64], sizes = [8, 32], strides = [1, 1]} : vector<8x128xf32> to vector<8x32xf32>
    %115 = vector.extract_strided_slice %111 {offsets = [0, 96], sizes = [8, 32], strides = [1, 1]} : vector<8x128xf32> to vector<8x32xf32>
    %116 = arith.mulf %113, %100 : vector<8x32xf32>
    %117 = arith.mulf %112, %114 : vector<8x32xf32>
    %118 = arith.addf %116, %117 : vector<8x32xf32>
    %119 = math.tanh %118 : vector<8x32xf32>
    %120 = arith.mulf %115, %119 : vector<8x32xf32>
    %121 = arith.truncf %120 : vector<8x32xf32> to vector<8x32xbf16>
    %122 = vector.extract_strided_slice %10 {offsets = [48, 0], sizes = [8, 128], strides = [1, 1]} : vector<64x128xf32> to vector<8x128xf32>
    %cst_27 = arith.constant dense<0.000000e+00> : vector<8x128xf32>
    %123 = tpu.matmul %121, %11, %cst_27 {dimension_numbers = #tpu.dot_dimension_numbers<[1], [0], [0], [1], [0, 0, 1, 1], [], []>} : vector<8x32xbf16>, vector<32x128xbf16>, vector<8x128xf32> -> vector<8x128xf32>
    %124 = arith.addf %122, %123 : vector<8x128xf32>
    %125 = math.tanh %124 : vector<8x128xf32>
    %cst_28 = arith.constant 5.000000e-01 : f32
    %126 = vector.broadcast %cst_28 : f32 to vector<8x128xf32>
    %127 = arith.mulf %126, %125 : vector<8x128xf32>
    %cst_29 = arith.constant 5.000000e-01 : f32
    %128 = vector.broadcast %cst_29 : f32 to vector<8x128xf32>
    %129 = arith.addf %127, %128 : vector<8x128xf32>
    %130 = vector.extract_strided_slice %129 {offsets = [0, 0], sizes = [8, 32], strides = [1, 1]} : vector<8x128xf32> to vector<8x32xf32>
    %131 = vector.extract_strided_slice %129 {offsets = [0, 32], sizes = [8, 32], strides = [1, 1]} : vector<8x128xf32> to vector<8x32xf32>
    %132 = vector.extract_strided_slice %125 {offsets = [0, 64], sizes = [8, 32], strides = [1, 1]} : vector<8x128xf32> to vector<8x32xf32>
    %133 = vector.extract_strided_slice %129 {offsets = [0, 96], sizes = [8, 32], strides = [1, 1]} : vector<8x128xf32> to vector<8x32xf32>
    %134 = arith.mulf %131, %118 : vector<8x32xf32>
    %135 = arith.mulf %130, %132 : vector<8x32xf32>
    %136 = arith.addf %134, %135 : vector<8x32xf32>
    %137 = math.tanh %136 : vector<8x32xf32>
    %138 = arith.mulf %133, %137 : vector<8x32xf32>
    %139 = arith.truncf %138 : vector<8x32xf32> to vector<8x32xbf16>
    %140 = vector.extract_strided_slice %10 {offsets = [56, 0], sizes = [8, 128], strides = [1, 1]} : vector<64x128xf32> to vector<8x128xf32>
    %cst_30 = arith.constant dense<0.000000e+00> : vector<8x128xf32>
    %141 = tpu.matmul %139, %11, %cst_30 {dimension_numbers = #tpu.dot_dimension_numbers<[1], [0], [0], [1], [0, 0, 1, 1], [], []>} : vector<8x32xbf16>, vector<32x128xbf16>, vector<8x128xf32> -> vector<8x128xf32>
    %142 = arith.addf %140, %141 : vector<8x128xf32>
    %143 = math.tanh %142 : vector<8x128xf32>
    %cst_31 = arith.constant 5.000000e-01 : f32
    %144 = vector.broadcast %cst_31 : f32 to vector<8x128xf32>
    %145 = arith.mulf %144, %143 : vector<8x128xf32>
    %cst_32 = arith.constant 5.000000e-01 : f32
    %146 = vector.broadcast %cst_32 : f32 to vector<8x128xf32>
    %147 = arith.addf %145, %146 : vector<8x128xf32>
    %148 = vector.extract_strided_slice %147 {offsets = [0, 0], sizes = [8, 32], strides = [1, 1]} : vector<8x128xf32> to vector<8x32xf32>
    %149 = vector.extract_strided_slice %147 {offsets = [0, 32], sizes = [8, 32], strides = [1, 1]} : vector<8x128xf32> to vector<8x32xf32>
    %150 = vector.extract_strided_slice %143 {offsets = [0, 64], sizes = [8, 32], strides = [1, 1]} : vector<8x128xf32> to vector<8x32xf32>
    %151 = vector.extract_strided_slice %147 {offsets = [0, 96], sizes = [8, 32], strides = [1, 1]} : vector<8x128xf32> to vector<8x32xf32>
    %152 = arith.mulf %149, %136 : vector<8x32xf32>
    %153 = arith.mulf %148, %150 : vector<8x32xf32>
    %154 = arith.addf %152, %153 : vector<8x32xf32>
    %155 = math.tanh %154 : vector<8x32xf32>
    %156 = arith.mulf %151, %155 : vector<8x32xf32>
    %157 = arith.truncf %156 : vector<8x32xf32> to vector<8x32xbf16>
    %c0_33 = arith.constant 0 : index
    %c0_34 = arith.constant 0 : index
    %158 = vector.load %arg4[%c0_33, %c0_34] : memref<32x256xbf16, #tpu.memory_space<vmem>>, vector<32x256xbf16>
    %cst_35 = arith.constant dense<0.000000e+00> : vector<8x256xf32>
    %159 = tpu.matmul %157, %158, %cst_35 {dimension_numbers = #tpu.dot_dimension_numbers<[1], [0], [0], [1], [0, 0, 1, 1], [], []>} : vector<8x32xbf16>, vector<32x256xbf16>, vector<8x256xf32> -> vector<8x256xf32>
    %c0_36 = arith.constant 0 : index
    %c0_37 = arith.constant 0 : index
    %160 = vector.load %arg5[%c0_36, %c0_37] : memref<1x256xf32, #tpu.memory_space<vmem>>, vector<1x256xf32>
    %161 = vector.broadcast %160 : vector<1x256xf32> to vector<8x256xf32>
    %162 = arith.addf %159, %161 : vector<8x256xf32>
    %cst_38 = arith.constant 0.000000e+00 : f32
    %163 = vector.broadcast %cst_38 : f32 to vector<8x256xf32>
    %164 = arith.maximumf %162, %163 : vector<8x256xf32>
    %c0_39 = arith.constant 0 : index
    %c0_40 = arith.constant 0 : index
    %165 = vector.load %arg6[%c0_39, %c0_40] : memref<1x256xf32, #tpu.memory_space<vmem>>, vector<1x256xf32>
    %166 = vector.broadcast %165 : vector<1x256xf32> to vector<8x256xf32>
    %167 = arith.mulf %164, %166 : vector<8x256xf32>
    %cst_41 = arith.constant dense<0.000000e+00> : vector<8xf32>
    %168 = vector.multi_reduction <add>, %167, %cst_41 [1] : vector<8x256xf32> to vector<8xf32>
    %169 = vector.shape_cast %168 : vector<8xf32> to vector<8x1xf32>
    %c0_42 = arith.constant 0 : index
    %c0_43 = arith.constant 0 : index
    %170 = vector.load %arg7[%c0_42, %c0_43] : memref<1x1xf32, #tpu.memory_space<vmem>>, vector<1x1xf32>
    %171 = vector.broadcast %170 : vector<1x1xf32> to vector<8x1xf32>
    %172 = arith.addf %169, %171 : vector<8x1xf32>
    %173 = vector.shape_cast %172 : vector<8x1xf32> to vector<8x1xf32>
    %174 = vector.broadcast %173 : vector<8x1xf32> to vector<8x128xf32>
    %c0_44 = arith.constant 0 : index
    %c0_45 = arith.constant 0 : index
    %175 = vector.load %arg8[%c0_44, %c0_45] : memref<8x128xf32, #tpu.memory_space<vmem>>, vector<8x128xf32>
    tpu.vector_store %arg8[%c0_44, %c0_45], %174 {strides = array<i32>} : memref<8x128xf32, #tpu.memory_space<vmem>>, vector<8x128xf32>,
    return
  }
}

</mosaic_0001>

<bundles_post_ra>
// kernel: sentiment_forward.1
= control target key start
LH: loop header
LB: loop body
LE: loop exit
PB: predicated region body
PF: predicated region fallthrough
CT: control target
= control target key end

     0   :  { %v40_v0 = vlaneseq  ;;  %v690_v3 = vmov 0   ;;  %v691_v11 = vmov 0.0   ;;  %vm106_vm2 = vcmask 523264   ;;  %s693_s22 = smov 32   ;;  %s903_s1 = inlined_call_operand.vmem [shape: bf16[64,128], index: 1, kind: input, shape index: {}]   ;;  %s904_s2 = inlined_call_operand.vmem [shape: bf16[32,128], index: 2, kind: input, shape index: {}]   ;;  %s905_s0 = inlined_call_operand.vmem [shape: s32[64,64], index: 0, kind: input, shape index: {}]   ;;  %s906_s3 = inlined_call_operand.vmem [shape: f32[1,128], index: 3, kind: input, shape index: {}]   ;;  %s907_s4 = inlined_call_operand.vmem [shape: bf16[32,256], index: 4, kind: input, shape index: {}]   ;;  %s908_s7 = inlined_call_operand.<no memory space> [shape: f32[1,1], index: 7, kind: input, shape index: {}]   ;;  %s909_s5 = inlined_call_operand.vmem [shape: f32[1,256], index: 5, kind: input, shape index: {}]   ;;  %s910_s6 = inlined_call_operand.vmem [shape: f32[1,256], index: 6, kind: input, shape index: {}]   ;;  %s911_s8 = inlined_call_operand.vmem [shape: f32[8,128], index: 8, kind: output, shape index: {}]  }
   0x1   :  { %v644_v1 = vld [vmem:[%s903_s1 + $0x18] sm:$0xff]  ;;  %v745_v2 = vld [vmem:[%s904_s2 + $0x8] sm:$0xff]  ;;  %655 = vset.pattern.permute.xlu0 %v690_v3  ;;  %v643_v4 = vld [vmem:[%s903_s1 + $0x10] sm:$0xff]  ;;  %vm164_vm3 = vcmask 261120  }
   0x2   :  { %123 = vmatpush.bf16.msra.mxu0 %v644_v1  ;;  %174 = vmatpush.bf16.msra.mxu1 %v745_v2  ;;  %v645_v5 = vld [vmem:[%s904_s2] sm:$0xff]  ;;  %v754_v6 = vand.u32 127, %v40_v0  ;;  %v33_v8 = vld [vmem:[%s905_s0 + $0x8] sm:$0xff]  ;;  %v34_v48 = vld [vmem:[%s905_s0 + $0x10] sm:$0xff] }
   0x3   :  { %215 = vmatpush.bf16.msra.mxu2 %v745_v2  ;;  %256 = vmatpush.bf16.msra.mxu3 %v745_v2  ;;  %v32_v7 = vld [vmem:[%s905_s0] sm:$0xff]  ;;  %v642_v9 = vld [vmem:[%s903_s1 + $0x8] sm:$0xff]  ;;  %v35_v49 = vld [vmem:[%s905_s0 + $0x18] sm:$0xff] }
   0x4   :  { %vm42_vm0 = vcmp.eq.s32.totalorder %v32_v7, %v754_v6  ;;  %vm43_vm1 = vcmp.eq.s32.totalorder %v33_v8, %v754_v6  ;;  %v641_v10 = vld [vmem:[%s903_s1] sm:$0xff]  ;;  %s692_s1 = smov 64   ;;  %vm44_vm4 = vcmp.eq.s32.totalorder %v34_v48, %v754_v6  ;;  %vm45_vm5 = vcmp.eq.s32.totalorder %v35_v49, %v754_v6 }
   0x5   :  { %v580_v12 = vsel %vm42_vm0, 1.0, %v691_v11  ;;  %v581_v13 = vsel %vm43_vm1, 1.0, %v691_v11  ;;  %v782_v16 = vld [vmem:[%s906_s3] ss:$0 sm:$0xff]  ;;  %v582_v50 = vsel %vm44_vm4, 1.0, %v691_v11  ;;  %v583_v51 = vsel %vm45_vm5, 1.0, %v691_v11 }
   0x6   :  { %124 = vmatpush.bf16.msra.mxu0 %v643_v4  ;;  %175 = vmatpush.bf16.msra.mxu1 %v645_v5  ;;  %v66_v14 = vpack.c.bf16 %v581_v13, %v580_v12  ;;  %v67_v52 = vpack.c.bf16 %v583_v51, %v582_v50 }
   0x7   :  { %216 = vmatpush.bf16.msra.mxu2 %v645_v5  ;;  %257 = vmatpush.bf16.msra.mxu3 %v645_v5 }
   0x9   :  { %176 = vmatmul.bf16.vlgmr.msra.gmra.mxu1 %v690_v3 }
   0xa   :  { %297 = vmatpush.bf16.msrb.mxu1 %v745_v2  ;;  %125 = vmatpush.bf16.msra.mxu0 %v642_v9 }
   0xb   :  { %338 = vmatpush.bf16.msrb.mxu2 %v745_v2  ;;  %379 = vmatpush.bf16.msrb.mxu3 %v745_v2 }
   0xe   :  { %298 = vmatpush.bf16.msrb.mxu1 %v645_v5  ;;  %126 = vmatpush.bf16.msra.mxu0 %v641_v10 }
   0xf   :  { %339 = vmatpush.bf16.msrb.mxu2 %v645_v5  ;;  %380 = vmatpush.bf16.msrb.mxu3 %v645_v5 }
  0x11   :  { %604 = vmatmul.msk.bf16.vlgmr.msra.gmra.mxu0 %vm106_vm2, %v66_v14 }
  0x12   :  { %420 = vmatpush.bf16.msra.mxu1 %v745_v2 }
  0x16   :  { %421 = vmatpush.bf16.msra.mxu1 %v645_v5 }
  0x21   :  { %605 = vmatmul.msk.bf16.gmra.mxu0 %vm106_vm2, %v67_v52 }
  0x86   :  { %v177_v15 = vpop.f32.mrf.mxu1 }
  0x8e   :  { %v128_v17 = vpop.f32.mrf.mxu0  ;;  %v179_v18 = vpop.f32.mrf.mxu1 }
  0x8f   :  { %v129_v19 = vadd.f32 %v782_v16, %v128_v17 }
  0x91   :  { %v181_v20 = vadd.f32 %v177_v15, %v129_v19 }
  0x93   :  { %658 = vtanh.f32 %v181_v20 }
  0x96   :  { %v130_v34 = vpop.f32.mrf.mxu0 }
  0x97   :  { %v131_v35 = vadd.f32 %v782_v16, %v130_v34 }
  0x99   :  { %v659_v21 = vpop.eup %658 }
  0x9a   :  { %187 = vrot.lane.b32.xlu0 %v659_v21, %s692_s1  ;;  %v183_v22 = vmul.f32 0.5, %v659_v21 }
  0x9c   :  { %v184_v23 = vadd.f32 0.5, %v183_v22 }
  0x9e   :  { %v185_v26 = vmul.f32 0.0, %v184_v23  ;;  %v133_v57 = vpop.f32.mrf.mxu0 }
  0x9f   :  { %v134_v58 = vadd.f32 %v782_v16, %v133_v57 }
  0xa6   :  { %v135_v13 = vpop.f32.mrf.mxu0 }
  0xa7   :  { %v136_v14 = vadd.f32 %v782_v16, %v135_v13 }
 0x10c   :  { %v188_v24 = vpop.permute.xlu0 %187 }
 0x10d   :  { %v190_v25 = vmul.f32 %v188_v24, %v184_v23 }
 0x10f   :  { %192 = vrot.lane.b32.xlu0 %v190_v25, %s693_s22 }
 0x181   :  { %v193_v27 = vpop.permute.xlu0 %192 }
 0x182   :  { %v195_v28 = vadd.f32 %v193_v27, %v185_v26 }
 0x184   :  { %660 = vtanh.f32 %v195_v28 }
 0x18a   :  { %v661_v29 = vpop.eup %660 }
 0x18b   :  { %198 = vrot.lane.b32.xlu1 %v661_v29, %s692_s1  ;;  %v37_v29 = vld [vmem:[%s905_s0 + $0x28] sm:$0xff] }
 0x18c   :  { %vm47_vm7 = vcmp.eq.s32.totalorder %v37_v29, %v754_v6 }
 0x1fd   :  { %v199_v30 = vpop.permute.xlu1 %198 }
 0x1fe   :  { %v201_v31 = vmul.f32 %v199_v30, %v184_v23 }
 0x200   :  { %v202_v32 = vpack.c.bf16 %v201_v31, %v201_v31  ;;  %v585_v31 = vsel %vm47_vm7, 1.0, %v691_v11 }
 0x202   :  { %204 = vrot.lane.b32.xlu1 %v202_v32, %s693_s22 }
 0x274   :  { %v205_v33 = vpop.permute.xlu1 %204 }
 0x275   :  { %616 = vmatmul.msk.bf16.vlgmr.msra.gmra.mxu2 %vm164_vm3, %v205_v33 }
 0x276   :  { %461 = vmatpush.bf16.msra.mxu2 %v745_v2 }
 0x27a   :  { %462 = vmatpush.bf16.msra.mxu2 %v645_v5 }
 0x2f8   :  { %v218_v36 = vpop.f32.mrf.mxu2 }
 0x2f9   :  { %v222_v37 = vadd.f32 %v218_v36, %v131_v35 }
 0x2fb   :  { %662 = vtanh.f32 %v222_v37 }
 0x300   :  { %v220_v38 = vpop.f32.mrf.mxu2 }
 0x301   :  { %v663_v39 = vpop.eup %662 }
 0x302   :  { %228 = vrot.lane.b32.xlu2 %v663_v39, %s692_s1  ;;  %v224_v40 = vmul.f32 0.5, %v663_v39 }
 0x304   :  { %v225_v41 = vadd.f32 0.5, %v224_v40 }
 0x306   :  { %v226_v44 = vmul.f32 %v225_v41, %v195_v28  ;;  %v36_v28 = vld [vmem:[%s905_s0 + $0x20] sm:$0xff] }
 0x307   :  { %vm46_vm6 = vcmp.eq.s32.totalorder %v36_v28, %v754_v6 }
 0x308   :  { %v584_v30 = vsel %vm46_vm6, 1.0, %v691_v11 }
 0x309   :  { %v68_v32 = vpack.c.bf16 %v585_v31, %v584_v30 }
 0x30b   :  { %606 = vmatmul.msk.bf16.gmra.mxu0 %vm106_vm2, %v68_v32 }
 0x35c   :  { %v229_v42 = vpop.permute.xlu2 %228 }
 0x35d   :  { %v231_v43 = vmul.f32 %v229_v42, %v225_v41 }
 0x35f   :  { %233 = vrot.lane.b32.xlu2 %v231_v43, %s693_s22 }
 0x388   :  { %v138_v37 = vpop.f32.mrf.mxu0 }
 0x389   :  { %v139_v38 = vadd.f32 %v782_v16, %v138_v37 }
 0x3b9   :  { %v234_v45 = vpop.permute.xlu2 %233 }
 0x3ba   :  { %v236_v46 = vadd.f32 %v234_v45, %v226_v44 }
 0x3bc   :  { %664 = vtanh.f32 %v236_v46 }
 0x3c2   :  { %v665_v47 = vpop.eup %664 }
 0x3c3   :  { %239 = vrot.lane.b32.xlu0 %v665_v47, %s692_s1 }
 0x435   :  { %v240_v53 = vpop.permute.xlu0 %239 }
 0x436   :  { %v242_v54 = vmul.f32 %v240_v53, %v225_v41 }
 0x438   :  { %v243_v55 = vpack.c.bf16 %v242_v54, %v242_v54 }
 0x43a   :  { %245 = vrot.lane.b32.xlu1 %v243_v55, %s693_s22  ;;  %v140_v55 = vpop.f32.mrf.mxu0 }
 0x4ac   :  { %v246_v56 = vpop.permute.xlu1 %245 }
 0x4ad   :  { %617 = vmatmul.msk.bf16.vlgmr.msra.gmra.mxu3 %vm164_vm3, %v246_v56  ;;  %v141_v56 = vadd.f32 %v782_v16, %v140_v55  ;;  %v627_v55 = vld [vmem:[%s907_s4 + $0x8] sm:$0xf0] }
 0x530   :  { %v259_v59 = vpop.f32.mrf.mxu3 }
 0x531   :  { %v263_v60 = vadd.f32 %v259_v59, %v134_v58 }
 0x533   :  { %666 = vtanh.f32 %v263_v60 }
 0x538   :  { %v261_v61 = vpop.f32.mrf.mxu3 }
 0x539   :  { %v667_v62 = vpop.eup %666 }
 0x53a   :  { %269 = vrot.lane.b32.xlu2 %v667_v62, %s692_s1  ;;  %v265_v63 = vmul.f32 0.5, %v667_v62 }
 0x53c   :  { %v266_v0 = vadd.f32 0.5, %v265_v63 }
 0x53e   :  { %v267_v3 = vmul.f32 %v266_v0, %v236_v46 }
 0x594   :  { %v270_v1 = vpop.permute.xlu2 %269 }
 0x595   :  { %v272_v2 = vmul.f32 %v270_v1, %v266_v0 }
 0x597   :  { %274 = vrot.lane.b32.xlu0 %v272_v2, %s693_s22 }
 0x609   :  { %v275_v4 = vpop.permute.xlu0 %274 }
 0x60a   :  { %v277_v5 = vadd.f32 %v275_v4, %v267_v3 }
 0x60c   :  { %668 = vtanh.f32 %v277_v5 }
 0x612   :  { %v669_v7 = vpop.eup %668 }
 0x613   :  { %280 = vrot.lane.b32.xlu1 %v669_v7, %s692_s1  ;;  %v39_v7 = vld [vmem:[%s905_s0 + $0x38] sm:$0xff] }
 0x614   :  { %vm49_vm9 = vcmp.eq.s32.totalorder %v39_v7, %v754_v6 }
 0x685   :  { %v281_v8 = vpop.permute.xlu1 %280 }
 0x686   :  { %v283_v9 = vmul.f32 %v281_v8, %v266_v0 }
 0x688   :  { %v284_v10 = vpack.c.bf16 %v283_v9, %v283_v9  ;;  %v587_v9 = vsel %vm49_vm9, 1.0, %v691_v11 }
 0x68a   :  { %286 = vrot.lane.b32.xlu2 %v284_v10, %s693_s22 }
 0x6e4   :  { %v287_v12 = vpop.permute.xlu2 %286 }
 0x6e5   :  { %618 = vmatmul.msk.bf16.vlgmr.msrb.gmra.mxu1 %vm164_vm3, %v287_v12 }
 0x762   :  { %v300_v15 = vpop.f32.mrf.mxu1 }
 0x763   :  { %v304_v17 = vadd.f32 %v300_v15, %v136_v14 }
 0x765   :  { %670 = vtanh.f32 %v304_v17 }
 0x76a   :  { %v302_v18 = vpop.f32.mrf.mxu1 }
 0x76b   :  { %v671_v19 = vpop.eup %670 }
 0x76c   :  { %310 = vrot.lane.b32.xlu0 %v671_v19, %s692_s1  ;;  %v306_v20 = vmul.f32 0.5, %v671_v19 }
 0x76e   :  { %v307_v21 = vadd.f32 0.5, %v306_v20 }
 0x770   :  { %v308_v24 = vmul.f32 %v307_v21, %v277_v5  ;;  %v38_v5 = vld [vmem:[%s905_s0 + $0x30] sm:$0xff] }
 0x771   :  { %vm48_vm8 = vcmp.eq.s32.totalorder %v38_v5, %v754_v6 }
 0x772   :  { %v586_v8 = vsel %vm48_vm8, 1.0, %v691_v11 }
 0x773   :  { %v69_v10 = vpack.c.bf16 %v587_v9, %v586_v8 }
 0x775   :  { %607 = vmatmul.msk.bf16.gmra.mxu0 %vm106_vm2, %v69_v10 }
 0x7de   :  { %v311_v22 = vpop.permute.xlu0 %310 }
 0x7df   :  { %v313_v23 = vmul.f32 %v311_v22, %v307_v21 }
 0x7e1   :  { %315 = vrot.lane.b32.xlu1 %v313_v23, %s693_s22 }
 0x7f2   :  { %v143_v17 = vpop.f32.mrf.mxu0 }
 0x7f3   :  { %v144_v18 = vadd.f32 %v782_v16, %v143_v17 }
 0x853   :  { %v316_v25 = vpop.permute.xlu1 %315 }
 0x854   :  { %v318_v26 = vadd.f32 %v316_v25, %v308_v24 }
 0x856   :  { %672 = vtanh.f32 %v318_v26 }
 0x85c   :  { %v673_v27 = vpop.eup %672 }
 0x85d   :  { %321 = vrot.lane.b32.xlu2 %v673_v27, %s692_s1 }
 0x8b7   :  { %v322_v33 = vpop.permute.xlu2 %321 }
 0x8b8   :  { %v324_v34 = vmul.f32 %v322_v33, %v307_v21  ;;  %v145_v33 = vpop.f32.mrf.mxu0 }
 0x8ba   :  { %v325_v35 = vpack.c.bf16 %v324_v34, %v324_v34  ;;  %v146_v34 = vadd.f32 %v782_v16, %v145_v33  ;;  %v633_v16 = vld [vmem:[%s907_s4 + $0x10] sm:$0xf] }
 0x8bc   :  { %327 = vrot.lane.b32.xlu0 %v325_v35, %s693_s22 }
 0x92e   :  { %v328_v36 = vpop.permute.xlu0 %327 }
 0x92f   :  { %619 = vmatmul.msk.bf16.vlgmr.msrb.gmra.mxu2 %vm164_vm3, %v328_v36 }
 0x9b2   :  { %v341_v39 = vpop.f32.mrf.mxu2 }
 0x9b3   :  { %v345_v40 = vadd.f32 %v341_v39, %v139_v38 }
 0x9b5   :  { %674 = vtanh.f32 %v345_v40 }
 0x9ba   :  { %v343_v41 = vpop.f32.mrf.mxu2 }
 0x9bb   :  { %v675_v42 = vpop.eup %674 }
 0x9bc   :  { %351 = vrot.lane.b32.xlu1 %v675_v42, %s692_s1  ;;  %v347_v43 = vmul.f32 0.5, %v675_v42 }
 0x9be   :  { %v348_v44 = vadd.f32 0.5, %v347_v43 }
 0x9c0   :  { %v349_v47 = vmul.f32 %v348_v44, %v318_v26 }
 0xa2e   :  { %v352_v45 = vpop.permute.xlu1 %351 }
 0xa2f   :  { %v354_v46 = vmul.f32 %v352_v45, %v348_v44 }
 0xa31   :  { %356 = vrot.lane.b32.xlu2 %v354_v46, %s693_s22 }
 0xa8b   :  { %v357_v48 = vpop.permute.xlu2 %356 }
 0xa8c   :  { %v359_v49 = vadd.f32 %v357_v48, %v349_v47  ;;  %v650_v47 = vld [vmem:[%s907_s4 + $0x14] sm:$0xf0]  ;;  %v649_v48 = vld [vmem:[%s907_s4 + $0x14] sm:$0xf] }
 0xa8e   :  { %676 = vtanh.f32 %v359_v49 }
 0xa94   :  { %v677_v50 = vpop.eup %676 }
 0xa95   :  { %362 = vrot.lane.b32.xlu0 %v677_v50, %s692_s1  ;;  %v635_v50 = vld [vmem:[%s907_s4 + $0x18] sm:$0xf0] }
 0xb07   :  { %v363_v51 = vpop.permute.xlu0 %362 }
 0xb08   :  { %v365_v52 = vmul.f32 %v363_v51, %v348_v44  ;;  %v625_v51 = vld [vmem:[%s907_s4] sm:$0xf] }
 0xb0a   :  { %v366_v53 = vpack.c.bf16 %v365_v52, %v365_v52  ;;  %v648_v52 = vld [vmem:[%s907_s4 + $0x4] sm:$0xf0] }
 0xb0c   :  { %368 = vrot.lane.b32.xlu1 %v366_v53, %s693_s22  ;;  %v638_v53 = vor.u32 %v649_v48, %v635_v50 }
 0xb0e   :  { %545 = vmatpush.bf16.msrb.mxu1 %v638_v53 }
 0xb7e   :  { %v369_v54 = vpop.permute.xlu1 %368 }
 0xb7f   :  { %620 = vmatmul.msk.bf16.vlgmr.msrb.gmra.mxu3 %vm164_vm3, %v369_v54  ;;  %v647_v54 = vld [vmem:[%s907_s4 + $0x4] sm:$0xf] }
 0xc02   :  { %v382_v57 = vpop.f32.mrf.mxu3 }
 0xc03   :  { %v386_v58 = vadd.f32 %v382_v57, %v141_v56  ;;  %v626_v56 = vor.u32 %v648_v52, %v625_v51  ;;  %v630_v57 = vor.u32 %v647_v54, %v627_v55 }
 0xc05   :  { %678 = vtanh.f32 %v386_v58  ;;  %546 = vmatpush.bf16.msrb.mxu1 %v630_v57 }
 0xc0a   :  { %v384_v59 = vpop.f32.mrf.mxu3 }
 0xc0b   :  { %v679_v60 = vpop.eup %678 }
 0xc0c   :  { %392 = vrot.lane.b32.xlu2 %v679_v60, %s692_s1  ;;  %v388_v61 = vmul.f32 0.5, %v679_v60 }
 0xc0e   :  { %v389_v62 = vadd.f32 0.5, %v388_v61 }
 0xc10   :  { %v390_v1 = vmul.f32 %v389_v62, %v359_v49  ;;  %v634_v49 = vor.u32 %v650_v47, %v633_v16 }
 0xc12   :  { %532 = vmatpush.bf16.msra.mxu3 %v634_v49 }
 0xc16   :  { %533 = vmatpush.bf16.msra.mxu3 %v626_v56 }
 0xc66   :  { %v393_v63 = vpop.permute.xlu2 %392 }
 0xc67   :  { %v395_v0 = vmul.f32 %v393_v63, %v389_v62  ;;  %v494_v63 = vld [vmem:[%s909_s5] sm:$0x3] }
 0xc69   :  { %397 = vrot.lane.b32.xlu0 %v395_v0, %s693_s22  ;;  %v497_v0 = vperm.slane %v494_v63, 1 }
 0xcdb   :  { %v398_v2 = vpop.permute.xlu0 %397 }
 0xcdc   :  { %v400_v3 = vadd.f32 %v398_v2, %v390_v1 }
 0xcde   :  { %680 = vtanh.f32 %v400_v3 }
 0xce4   :  { %v681_v4 = vpop.eup %680 }
 0xce5   :  { %403 = vrot.lane.b32.xlu1 %v681_v4, %s692_s1  ;;  %v554_v4 = vld [vmem:[%s910_s6] sm:$0x3] }
 0xce6   :  { %v557_v8 = vperm.slane %v554_v4, 1  ;;  %v556_v10 = vperm.slane %v554_v4, 0 }
 0xd57   :  { %v404_v12 = vpop.permute.xlu1 %403 }
 0xd58   :  { %v406_v13 = vmul.f32 %v404_v12, %v389_v62  ;;  %v13_v62 = vstv %s908_s7 }
 0xd59   :  { %14 = vst [vmem:[#allocation2] sm:$0x1] %v13_v62 }
 0xd5a   :  { %v407_v14 = vpack.c.bf16 %v406_v13, %v406_v13 }
 0xd5c   :  { %409 = vrot.lane.b32.xlu2 %v407_v14, %s693_s22 }
 0xdb6   :  { %v410_v15 = vpop.permute.xlu2 %409 }
 0xdb7   :  { %621 = vmatmul.msk.bf16.vlgmr.msra.gmra.mxu1 %vm164_vm3, %v410_v15 }
 0xe34   :  { %v423_v19 = vpop.f32.mrf.mxu1 }
 0xe35   :  { %v427_v6 = vadd.f32 %v423_v19, %v144_v18  ;;  %v657_v19 = vld [vmem:[#allocation2] ss:$0 sm:$0xff] }
 0xe37   :  { %682 = vtanh.f32 %v427_v6 }
 0xe3c   :  { %v425_v20 = vpop.f32.mrf.mxu1 }
 0xe3d   :  { %v683_v21 = vpop.eup %682 }
 0xe3e   :  { %433 = vrot.lane.b32.xlu0 %v683_v21, %s692_s1  ;;  %v429_v11 = vmul.f32 0.5, %v683_v21 }
 0xe40   :  { %v430_v22 = vadd.f32 0.5, %v429_v11 }
 0xe42   :  { %v431_v25 = vmul.f32 %v430_v22, %v400_v3  ;;  %v496_v3 = vperm.slane %v494_v63, 0 }
 0xeb0   :  { %v434_v23 = vpop.permute.xlu0 %433 }
 0xeb1   :  { %v436_v24 = vmul.f32 %v434_v23, %v430_v22 }
 0xeb3   :  { %438 = vrot.lane.b32.xlu1 %v436_v24, %s693_s22 }
 0xf25   :  { %v439_v26 = vpop.permute.xlu1 %438 }
 0xf26   :  { %v441_v27 = vadd.f32 %v439_v26, %v431_v25 }
 0xf28   :  { %684 = vtanh.f32 %v441_v27 }
 0xf2e   :  { %v685_v28 = vpop.eup %684 }
 0xf2f   :  { %444 = vrot.lane.b32.xlu2 %v685_v28, %s692_s1 }
 0xf89   :  { %v445_v29 = vpop.permute.xlu2 %444 }
 0xf8a   :  { %v447_v30 = vmul.f32 %v445_v29, %v430_v22 }
 0xf8c   :  { %v448_v31 = vpack.c.bf16 %v447_v30, %v447_v30 }
 0xf8e   :  { %450 = vrot.lane.b32.xlu0 %v448_v31, %s693_s22 }
0x1000   :  { %v451_v32 = vpop.permute.xlu0 %450 }
0x1001   :  { %622 = vmatmul.msk.bf16.vlgmr.msra.gmra.mxu2 %vm164_vm3, %v451_v32 }
0x1084   :  { %v464_v35 = vpop.f32.mrf.mxu2 }
0x1085   :  { %v468_v36 = vadd.f32 %v464_v35, %v146_v34 }
0x1087   :  { %686 = vtanh.f32 %v468_v36 }
0x108c   :  { %v466_v37 = vpop.f32.mrf.mxu2 }
0x108d   :  { %v687_v38 = vpop.eup %686 }
0x108e   :  { %474 = vrot.lane.b32.xlu1 %v687_v38, %s692_s1  ;;  %v470_v39 = vmul.f32 0.5, %v687_v38 }
0x1090   :  { %v471_v40 = vadd.f32 0.5, %v470_v39 }
0x1092   :  { %v472_v43 = vmul.f32 %v471_v40, %v441_v27 }
0x1100   :  { %v475_v41 = vpop.permute.xlu1 %474 }
0x1101   :  { %v477_v42 = vmul.f32 %v475_v41, %v471_v40 }
0x1103   :  { %479 = vrot.lane.b32.xlu2 %v477_v42, %s693_s22 }
0x115d   :  { %v480_v44 = vpop.permute.xlu2 %479 }
0x115e   :  { %v482_v45 = vadd.f32 %v480_v44, %v472_v43 }
0x1160   :  { %688 = vtanh.f32 %v482_v45 }
0x1166   :  { %v689_v46 = vpop.eup %688 }
0x1167   :  { %485 = vrot.lane.b32.xlu0 %v689_v46, %s692_s1 }
0x11d9   :  { %v486_v58 = vpop.permute.xlu0 %485 }
0x11da   :  { %v488_v59 = vmul.f32 %v486_v58, %v471_v40 }
0x11dc   :  { %v489_v60 = vpack.c.bf16 %v488_v59, %v488_v59 }
0x11de   :  { %501 = vrot.lane.b32.xlu1 %v489_v60, %s693_s22 }
0x1250   :  { %v502_v61 = vpop.permute.xlu1 %501 }
0x1251   :  { %639 = vmatmul.msk.bf16.vlgmr.msra.gmra.mxu3 %vm164_vm3, %v502_v61  ;;  %640 = vmatmul.msk.bf16.vlgmr.msrb.gmra.mxu1 %vm164_vm3, %v502_v61 }
0x12ce   :  { %v548_v1 = vpop.f32.mrf.mxu1 }
0x12cf   :  { %v549_v2 = vadd.f32 %v548_v1, %v497_v0 }
0x12d1   :  { %v553_v7 = vmax.f32 %v549_v2, 0.0 }
0x12d3   :  { %v561_v14 = vmul.f32 %v557_v8, %v553_v7 }
0x12d4   :  { %v535_v5 = vpop.f32.mrf.mxu3 }
0x12d5   :  { %v536_v9 = vadd.f32 %v535_v5, %v496_v3 }
0x12d6   :  { %v550_v12 = vpop.f32.mrf.mxu1 }
0x12d7   :  { %v552_v13 = vmax.f32 %v536_v9, 0.0 }
0x12d9   :  { %v560_v15 = vmul.f32 %v556_v10, %v552_v13 }
0x12db   :  { %v562_v17 = vadd.f32 %v561_v14, %v560_v15 }
0x12dc   :  { %v537_v18 = vpop.f32.mrf.mxu3 }
0x12dd   :  { %563 = vadd.xlane.f32.xlu2 %v562_v17 }
0x1350   :  { %v564_v6 = vpop.xlane.xlu2 %563 }
0x1351   :  { %v569_v20 = vadd.f32 %v657_v19, %v564_v6 }
0x1353   :  { %572 = vperm.xlu0 %655, %v569_v20  }
0x13c5   :  { %v573_v21 = vpop.permute.xlu0 %572 }
0x13c6   :  { %575 = vst [vmem:[%s911_s8] sm:$0xff] %v573_v21 }

</bundles_post_ra>
